<compile_context>
chip_gen: v6e
topology: v6e:2x2x1
jax: 0.10.0
libtpu: 0.0.40
codegen_flags: <defaults>
</compile_context>

<pallas_src>
import functools

import jax
import jax.numpy as jnp
from jax.experimental import pallas as pl
from jax.experimental.pallas import tpu as pltpu

_EPS = 1e-12            # F.normalize default eps
_EPS_SQ = _EPS * _EPS   # rsqrt(max(s, eps^2)) == 1 / max(sqrt(s), eps)


def _vmem_capacity_bytes() -> int:
    """Physical per-core VMEM; conservative fallback if the query is unavailable."""
    try:
        cap = int(pltpu.get_tpu_info().vmem_capacity_bytes)
        if cap > 0:
            return cap
    except Exception:
        pass
    return 64 << 20  # v7x per-TensorCore VMEM (smallest across v5e/v6e/v7x)


def _round_up(x: int, m: int) -> int:
    return ((x + m - 1) // m) * m


def _align_kernel(a_ref, b_ref, s_ref, o_ref, *, seg, tiles_per_part, tile_rows,
                  valid_rows, mask_needed):
    """Accumulate sum over valid rows of -cos_sim(a_row, b_row) into o_ref (part p)."""
    p = pl.program_id(0)   # parallel (per-core) part
    i = pl.program_id(1)   # arbitrary (accumulation) axis

    # Constant output block index along the inner axis -> o_ref stays VMEM-resident
    # and doubles as the accumulator (single full vreg, unmasked loads/stores).
    @pl.when(i == 0)
    def _():
        o_ref[...] = jnp.zeros_like(o_ref)

    a = a_ref[...].astype(jnp.float32)          # (tm, D_eff)
    b = b_ref[...].astype(jnp.float32)

    if seg == 1:
        # Plain per-row lane reduction (D was not lane-folded).
        s_aa = jnp.sum(a * a, axis=-1, keepdims=True)     # (tm, 1)
        s_bb = jnp.sum(b * b, axis=-1, keepdims=True)
        s_ab = jnp.sum(a * b, axis=-1, keepdims=True)
    else:
        # Lane-folded: each VMEM row carries `seg` original rows of width D.
        # Segmented reduce = matmul with the constant block-diagonal 0/1 matrix
        # s_ref (D_eff, seg); exact f32-level accumulation on the otherwise-idle MXU.
        # Precision.HIGH (bf16x3) halves the MXU passes if profiling shows MXU-bound.
        S = s_ref[...]
        dot = functools.partial(jnp.dot,
                                precision=jax.lax.Precision.HIGHEST,
                                preferred_element_type=jnp.float32)
        s_aa = dot(a * a, S)                               # (tm, seg)
        s_bb = dot(b * b, S)
        s_ab = dot(a * b, S)

    # F.normalize: x / max(||x||, eps); rsqrt(max(s, eps^2)) is exactly 1/max(sqrt(s), eps).
    inv = (jax.lax.rsqrt(jnp.maximum(s_aa, _EPS_SQ)) *
           jax.lax.rsqrt(jnp.maximum(s_bb, _EPS_SQ)))
    cos = s_ab * inv                                       # per-original-row cosine

    g = p * tiles_per_part + i                             # global (unclamped) tile index

    if mask_needed:
        row0 = g * tile_rows
        is_edge = row0 + tile_rows > valid_rows
        # Steady-state tiles skip the lane-sparse mask work entirely.

        @pl.when(jnp.logical_not(is_edge))
        def _():
            o_ref[...] = o_ref[...] - jnp.sum(cos)

        @pl.when(is_edge)
        def _():
            rows = row0 + jax.lax.broadcasted_iota(jnp.int32, cos.shape, 0)
            # Select-based masking: garbage in the OOB remainder cannot leak through.
            o_ref[...] = o_ref[...] - jnp.sum(jnp.where(rows < valid_rows, cos, 0.0))
    else:
        o_ref[...] = o_ref[...] - jnp.sum(cos)


def align_loss(latent_inputs, latent_predictions, align_weight=0.0, split="train"):
    """JAX/Pallas equivalent of AlignLoss.forward. Returns (loss, log)."""
    assert latent_inputs.shape == latent_predictions.shape
    shape = latent_inputs.shape
    D = shape[-1]
    M = 1
    for s in shape[:-1]:
        M *= s
    M = max(M, 1)

    # Module default align_weight == 0.0 -> loss is statically zero; skip all HBM traffic.
    if isinstance(align_weight, (int, float)) and float(align_weight) == 0.0:
        loss = jnp.zeros((), jnp.float32)
        return loss, {f"{split}/loss/align": loss}

    # ---- lane folding for small D --------------------------------------------------
    if D < 128 and 128 % D == 0 and M % (128 // D) == 0:
        seg = 128 // D                    # original rows packed per folded row
    else:
        seg = 1
    M_eff = M // seg
    D_eff = D * seg

    # Keep native storage dtype (bf16 stays bf16); reshape is free (row-major).
    a2d = latent_inputs.reshape(M_eff, D_eff)
    b2d = latent_predictions.reshape(M_eff, D_eff)

    # Constant block-diagonal 0/1 matrix performing the segmented per-original-row reduce.
    S = (jnp.arange(D_eff)[:, None] // D == jnp.arange(seg)[None, :]).astype(jnp.float32)

    itemsize = jnp.dtype(a2d.dtype).itemsize
    granule = (8 * 4) // itemsize         # sublane packing: f32 -> 8, bf16 -> 16, 8-bit -> 32
    D_pad = _round_up(D_eff, 128)         # lane padding actually occupied in VMEM

    # Tiny inputs: zero-pad rows up to one sublane granule (zero rows give cos == 0
    # exactly, so they contribute nothing) -> exact-fit block, no in-kernel mask.
    if M_eff < granule:
        pad_rows = granule - M_eff
        a2d = jnp.pad(a2d, ((0, pad_rows), (0, 0)))
        b2d = jnp.pad(b2d, ((0, pad_rows), (0, 0)))
        M_eff = granule

    # ---- byte-based, padding-aware tile size ---------------------------------------
    vmem_cap = _vmem_capacity_bytes()
    target_f32_block = (4 << 20) if vmem_cap < (96 << 20) else (8 << 20)
    tm = max(granule, target_f32_block // (D_pad * 4))
    tm = min(tm, _round_up(M_eff, granule))            # don't over-allocate for small M
    tm = max(granule, (tm // granule) * granule)

    # ---- grid: (parallel parts, accumulation tiles) --------------------------------
    total_tiles = pl.cdiv(M_eff, tm)
    if total_tiles >= 8 or (total_tiles >= 2 and total_tiles % 2 == 0):
        # Feed both v7x TensorCores; at most one duplicated (fully masked) tail tile.
        num_parts = 2
    else:
        num_parts = 1
    tiles_per_part = (total_tiles + num_parts - 1) // num_parts
    mask_needed = (M_eff % tm != 0) or (num_parts * tiles_per_part != total_tiles)

    def in_index_map(p, i):
        # Clamp the duplicated tail tile of the last part back in range; the in-kernel
        # row mask (driven by the unclamped index) zeroes its contribution.
        g = jnp.minimum(p * tiles_per_part + i, total_tiles - 1)
        return (g, 0)

    kernel = functools.partial(
        _align_kernel,
        seg=seg,
        tiles_per_part=tiles_per_part,
        tile_rows=tm,
        valid_rows=M_eff,
        mask_needed=mask_needed,
    )

    # Padding-aware VMEM budget: 2 inputs x 2 pipeline buffers + ~3 live f32 temporaries
    # (a, b, one product) + slack, all at the lane-padded block size.
    block_f32 = tm * D_pad * 4
    vmem_limit = int(min(vmem_cap, max(9 * block_f32 + (4 << 20), 16 << 20)))

    cost = pl.CostEstimate(
        flops=8 * M * D,                                   # products + segmented reductions
        transcendentals=2 * M,                             # 2 rsqrt per row
        bytes_accessed=2 * M * D * itemsize + num_parts * 8 * 128 * 4,
    )

    partials = pl.pallas_call(
        kernel,
        out_shape=jax.ShapeDtypeStruct((num_parts * 8, 128), jnp.float32),
        grid_spec=pltpu.PrefetchScalarGridSpec(
            num_scalar_prefetch=0,
            grid=(num_parts, tiles_per_part),
            in_specs=[
                # TODO(synk): sweep pipeline_mode=pl.Buffered(3) here for v7x.
                pl.BlockSpec((tm, D_eff), in_index_map),
                pl.BlockSpec((tm, D_eff), in_index_map),
                # Constant block: fetched once, stays VMEM-resident across the grid.
                pl.BlockSpec((D_eff, seg), lambda p, i: (0, 0)),
            ],
            out_specs=pl.BlockSpec((8, 128), lambda p, i: (p, 0)),
        ),
        compiler_params=pltpu.CompilerParams(
            dimension_semantics=("parallel", "arbitrary"),
            vmem_limit_bytes=vmem_limit,
        ),
        cost_estimate=cost,
    )(a2d, b2d, S)

    # Each part's (8, 128) output block is filled with that part's full sum; read one lane.
    part_sums = partials[0::8, 0]                          # (num_parts,)
    # mean over all non-batch dims then over batch == mean over all M original rows.
    loss = (align_weight * (jnp.sum(part_sums) / jnp.float32(M))).astype(jnp.float32)
    log = {f"{split}/loss/align": loss}
    return loss, log


def _reference(a, b, align_weight):
    a32 = a.astype(jnp.float32)
    b32 = b.astype(jnp.float32)
    an = a32 / jnp.maximum(jnp.linalg.norm(a32, axis=-1, keepdims=True), _EPS)
    bn = b32 / jnp.maximum(jnp.linalg.norm(b32, axis=-1, keepdims=True), _EPS)
    per_tok = -(an * bn).sum(axis=-1)
    mean_flat = per_tok.reshape(per_tok.shape[0], -1).mean(axis=1)
    return align_weight * mean_flat.mean()


if __name__ == "__main__":
    key = jax.random.PRNGKey(0)
    k1, k2 = jax.random.split(key)

    B, N, D = 2, 8, 32           # batch, tokens, hidden
    align_weight = 0.5           # module default 0.0 is trivially zero; exercise the math

    latent_inputs = jax.random.normal(k1, (B, N, D), dtype=jnp.float32)
    latent_predictions = jax.random.normal(k2, (B, N, D), dtype=jnp.float32)

    loss, log = align_loss(latent_inputs, latent_predictions,
                           align_weight=align_weight, split="train")
    loss = jax.block_until_ready(loss)

    ref = _reference(latent_inputs, latent_predictions, align_weight)
    assert jnp.allclose(loss, ref, atol=1e-5, rtol=1e-5), (loss, ref)
    assert "train/loss/align" in log

    print("KERNEL_OK")
</pallas_src>

<mosaic_0001>
module attributes {stable_mosaic.version = 11 : i64} {
  func.func @_align_kernel(%arg0: i32, %arg1: i32, %arg2: memref<8x128xf32, #tpu.memory_space<vmem>>, %arg3: memref<8x128xf32, #tpu.memory_space<vmem>>, %arg4: memref<128x4xf32, #tpu.memory_space<vmem>>, %arg5: memref<8x128xf32, #tpu.memory_space<vmem>>) attributes {dimension_semantics = [#tpu.dimension_semantics<parallel>, #tpu.dimension_semantics<arbitrary>], iteration_bounds = array<i64: 1, 1>, scalar_prefetch = 0 : i64, scratch_operands = 0 : i64, tpu.core_type = #tpu.core_type<tc>, window_params = [{transform_indices = @transform_0, window_bounds = array<i64: 8, 128>}, {transform_indices = @transform_1, window_bounds = array<i64: 8, 128>}, {pipeline_mode = #tpu.pipeline_mode<synchronous>, transform_indices = @transform_2, window_bounds = array<i64: 128, 4>}, {transform_indices = @transform_3, window_bounds = array<i64: 8, 128>}]} {
    %c0_i32 = arith.constant 0 : i32
    %0 = arith.cmpi eq, %arg1, %c0_i32 : i32
    %1 = arith.extui %0 : i1 to i32
    %c0_i32_0 = arith.constant 0 : i32
    %2 = arith.cmpi ne, %1, %c0_i32_0 : i32
    scf.if %2 {
      %cst_15 = arith.constant 0.000000e+00 : f32
      %28 = vector.broadcast %cst_15 : f32 to vector<8x128xf32>
      %c0_16 = arith.constant 0 : index
      %c0_17 = arith.constant 0 : index
      %29 = vector.load %arg5[%c0_16, %c0_17] : memref<8x128xf32, #tpu.memory_space<vmem>>, vector<8x128xf32>
      tpu.vector_store %arg5[%c0_16, %c0_17], %28 {strides = array<i32>} : memref<8x128xf32, #tpu.memory_space<vmem>>, vector<8x128xf32>,
    } else {
    }
    %c0 = arith.constant 0 : index
    %c0_1 = arith.constant 0 : index
    %3 = vector.load %arg2[%c0, %c0_1] : memref<8x128xf32, #tpu.memory_space<vmem>>, vector<8x128xf32>
    %c0_2 = arith.constant 0 : index
    %c0_3 = arith.constant 0 : index
    %4 = vector.load %arg3[%c0_2, %c0_3] : memref<8x128xf32, #tpu.memory_space<vmem>>, vector<8x128xf32>
    %c0_4 = arith.constant 0 : index
    %c0_5 = arith.constant 0 : index
    %5 = vector.load %arg4[%c0_4, %c0_5] : memref<128x4xf32, #tpu.memory_space<vmem>>, vector<128x4xf32>
    %6 = arith.mulf %3, %3 : vector<8x128xf32>
    %cst = arith.constant dense<0.000000e+00> : vector<8x4xf32>
    %7 = tpu.matmul %6, %5, %cst {dimension_numbers = #tpu.dot_dimension_numbers<[1], [0], [0], [1], [0, 0, 1, 1], [], []>, precision = #tpu.contract_precision<fp32>} : vector<8x128xf32>, vector<128x4xf32>, vector<8x4xf32> -> vector<8x4xf32>
    %8 = arith.mulf %4, %4 : vector<8x128xf32>
    %cst_6 = arith.constant dense<0.000000e+00> : vector<8x4xf32>
    %9 = tpu.matmul %8, %5, %cst_6 {dimension_numbers = #tpu.dot_dimension_numbers<[1], [0], [0], [1], [0, 0, 1, 1], [], []>, precision = #tpu.contract_precision<fp32>} : vector<8x128xf32>, vector<128x4xf32>, vector<8x4xf32> -> vector<8x4xf32>
    %10 = arith.mulf %3, %4 : vector<8x128xf32>
    %cst_7 = arith.constant dense<0.000000e+00> : vector<8x4xf32>
    %11 = tpu.matmul %10, %5, %cst_7 {dimension_numbers = #tpu.dot_dimension_numbers<[1], [0], [0], [1], [0, 0, 1, 1], [], []>, precision = #tpu.contract_precision<fp32>} : vector<8x128xf32>, vector<128x4xf32>, vector<8x4xf32> -> vector<8x4xf32>
    %cst_8 = arith.constant 1.000000e-24 : f32
    %12 = vector.broadcast %cst_8 : f32 to vector<8x4xf32>
    %13 = arith.maximumf %7, %12 : vector<8x4xf32>
    %14 = math.rsqrt %13 : vector<8x4xf32>
    %cst_9 = arith.constant 1.000000e-24 : f32
    %15 = vector.broadcast %cst_9 : f32 to vector<8x4xf32>
    %16 = arith.maximumf %9, %15 : vector<8x4xf32>
    %17 = math.rsqrt %16 : vector<8x4xf32>
    %18 = arith.mulf %14, %17 : vector<8x4xf32>
    %19 = arith.mulf %11, %18 : vector<8x4xf32>
    %c0_10 = arith.constant 0 : index
    %c0_11 = arith.constant 0 : index
    %20 = vector.load %arg5[%c0_10, %c0_11] : memref<8x128xf32, #tpu.memory_space<vmem>>, vector<8x128xf32>
    %21 = vector.shape_cast %19 : vector<8x4xf32> to vector<1x8x4xf32>
    %cst_12 = arith.constant dense<0.000000e+00> : vector<1xf32>
    %22 = vector.multi_reduction <add>, %21, %cst_12 [1, 2] : vector<1x8x4xf32> to vector<1xf32>
    %23 = vector.shape_cast %22 : vector<1xf32> to vector<1x1x1xf32>
    %24 = vector.extract %23[0, 0, 0] : f32 from vector<1x1x1xf32>
    %25 = vector.broadcast %24 : f32 to vector<8x128xf32>
    %26 = arith.subf %20, %25 : vector<8x128xf32>
    %c0_13 = arith.constant 0 : index
    %c0_14 = arith.constant 0 : index
    %27 = vector.load %arg5[%c0_13, %c0_14] : memref<8x128xf32, #tpu.memory_space<vmem>>, vector<8x128xf32>
    tpu.vector_store %arg5[%c0_13, %c0_14], %26 {strides = array<i32>} : memref<8x128xf32, #tpu.memory_space<vmem>>, vector<8x128xf32>,
    return
  }
  func.func @transform_0(%arg0: i32, %arg1: i32) -> (i32, i32) {
    %c1_i32 = arith.constant 1 : i32
    %0 = arith.muli %arg0, %c1_i32 : i32
    %1 = arith.addi %0, %arg1 : i32
    %c0_i32 = arith.constant 0 : i32
    %2 = arith.minsi %1, %c0_i32 : i32
    %c0_i32_0 = arith.constant 0 : i32
    %c0_i32_1 = arith.constant 0 : i32
    return %2, %c0_i32_0 : i32, i32
  }
  func.func @transform_1(%arg0: i32, %arg1: i32) -> (i32, i32) {
    %c1_i32 = arith.constant 1 : i32
    %0 = arith.muli %arg0, %c1_i32 : i32
    %1 = arith.addi %0, %arg1 : i32
    %c0_i32 = arith.constant 0 : i32
    %2 = arith.minsi %1, %c0_i32 : i32
    %c0_i32_0 = arith.constant 0 : i32
    %c0_i32_1 = arith.constant 0 : i32
    return %2, %c0_i32_0 : i32, i32
  }
  func.func @transform_2(%arg0: i32, %arg1: i32) -> (i32, i32) {
    %c0_i32 = arith.constant 0 : i32
    %c0_i32_0 = arith.constant 0 : i32
    %c0_i32_1 = arith.constant 0 : i32
    return %c0_i32, %c0_i32_0 : i32, i32
  }
  func.func @transform_3(%arg0: i32, %arg1: i32) -> (i32, i32) {
    %c0_i32 = arith.constant 0 : i32
    %c0_i32_0 = arith.constant 0 : i32
    return %arg0, %c0_i32 : i32, i32
  }
}

</mosaic_0001>

<bundles_post_ra>
// kernel: tpu_custom_call.1
= control target key start
LH: loop header
LB: loop body
LE: loop exit
PB: predicated region body
PF: predicated region fallthrough
CT: control target
= control target key end

     0   :  { %v3032_v3 = vmov 0.0   ;;  %vm3033_vm0 = vmmov 0   ;;  %s3970_s0 = inlined_call_operand.vmem [shape: f32[8,128], index: 0, kind: input, shape index: {}]   ;;  %s3971_s1 = inlined_call_operand.vmem [shape: f32[8,128], index: 1, kind: input, shape index: {}]   ;;  %s3972_s2 = inlined_call_operand.vmem [shape: f32[128,4], index: 2, kind: input, shape index: {}]   ;;  %s3973_s3 = inlined_call_operand.hbm [shape: f32[8,128], index: 3, kind: output, shape index: {}]  }
   0x1   :  { %v91_v0 = vld [vmem:[%s3972_s2 + $0x78] sm:$0xff]  ;;  %v90_v1 = vld [vmem:[%s3972_s2 + $0x70] sm:$0xff]  ;;  %v89_v2 = vld [vmem:[%s3972_s2 + $0x68] sm:$0xff]  ;;  %2371 = vmatprep.subr.mxu0 %v3032_v3  ;;  %2406 = vmatprep.subr.mxu1 %v3032_v3 }
   0x2   :  { %v3065_v4 = vand.u32 4294901760, %v91_v0  ;;  %v3067_v5 = vand.u32 4294901760, %v90_v1  ;;  %v3069_v6 = vand.u32 4294901760, %v89_v2  ;;  %v88_v7 = vld [vmem:[%s3972_s2 + $0x60] sm:$0xff]  ;;  %v87_v8 = vld [vmem:[%s3972_s2 + $0x58] sm:$0xff]  ;;  %v86_v9 = vld [vmem:[%s3972_s2 + $0x50] sm:$0xff]  ;;  %2403 = vmatprep.mubr.msk.f32.mxu0 %vm3033_vm0, %v3032_v3  ;;  %2438 = vmatprep.mubr.msk.f32.mxu1 %vm3033_vm0, %v3032_v3 }
   0x3   :  { %v3081_v10 = vand.u32 4294901760, %v88_v7  ;;  %v3083_v11 = vand.u32 4294901760, %v87_v8  ;;  %v3085_v12 = vand.u32 4294901760, %v86_v9  ;;  %v85_v13 = vld [vmem:[%s3972_s2 + $0x48] sm:$0xff]  ;;  %v84_v14 = vld [vmem:[%s3972_s2 + $0x40] sm:$0xff]  ;;  %v83_v19 = vld [vmem:[%s3972_s2 + $0x38] sm:$0xff] }
   0x4   :  { %2372 = vmatpush3.msra.mxu0 %v3065_v4  ;;  %v3099_v15 = vsub.f32 %v91_v0, %v3065_v4  ;;  %v3102_v16 = vsub.f32 %v90_v1, %v3067_v5  ;;  %v3104_v17 = vand.u32 4294901760, %v85_v13  ;;  %v3107_v18 = vsub.f32 %v89_v2, %v3069_v6  ;;  %v82_v26 = vld [vmem:[%s3972_s2 + $0x30] sm:$0xff] }
   0x5   :  { %2373 = vmatprep.subr.mxu0 %v3032_v3  ;;  %v3114_v20 = vsub.f32 %v88_v7, %v3081_v10  ;;  %v3117_v21 = vsub.f32 %v87_v8, %v3083_v11  ;;  %v3129_v25 = vand.u32 4294901760, %v84_v14  ;;  %v3138_v28 = vand.u32 4294901760, %v83_v19 }
   0x6   :  { %2374 = vmatpush3.msra.mxu0 %v3067_v5  ;;  %v3121_v22 = vand.u32 4294901760, %v3099_v15  ;;  %v3124_v23 = vand.u32 4294901760, %v3102_v16  ;;  %v3127_v24 = vand.u32 4294901760, %v3107_v18  ;;  %v3144_v30 = vsub.f32 %v86_v9, %v3085_v12 }
   0x7   :  { %2375 = vmatprep.subr.mxu0 %v3032_v3  ;;  %v3136_v27 = vand.u32 4294901760, %v3114_v20  ;;  %v3141_v29 = vand.u32 4294901760, %v3117_v21 }
   0x8   :  { %8 = vsyncpa [#allocation3], 0  ;;  %2376 = vmatpush3.msra.mxu0 %v3069_v6  ;;  %v188_v31 = vsub.f32 %v3099_v15, %v3121_v22  ;;  %v195_v32 = vsub.f32 %v3102_v16, %v3124_v23  ;;  %v202_v33 = vsub.f32 %v3107_v18, %v3127_v24  ;;  %v3154_v34 = vsub.f32 %v85_v13, %v3104_v17  ;;  %v81_v36 = vld [vmem:[%s3972_s2 + $0x28] sm:$0xff]  ;;  %v80_v41 = vld [vmem:[%s3972_s2 + $0x20] sm:$0xff] }
   0x9   :  { %2377 = vmatprep.subr.mxu0 %v3032_v3  ;;  %v3157_v35 = vand.u32 4294901760, %v82_v26  ;;  %v209_v39 = vsub.f32 %v3114_v20, %v3136_v27  ;;  %v3170_v40 = vand.u32 4294901760, %v3144_v30  ;;  %v216_v42 = vsub.f32 %v3117_v21, %v3141_v29  ;;  %v74_v48 = vld [vmem:[%s3970_s0] sm:$0xff]  ;;  %v79_v50 = vld [vmem:[%s3972_s2 + $0x18] sm:$0xff]  ;;  %v78_v54 = vld [vmem:[%s3972_s2 + $0x10] sm:$0xff] }
   0xa   :  { %2378 = vmatpush3.msra.mxu0 %v3081_v10  ;;  %v3163_v37 = vand.u32 4294901760, %v188_v31  ;;  %v3165_v38 = vand.u32 4294901760, %v195_v32  ;;  %v3179_v43 = vsub.f32 %v84_v14, %v3129_v25  ;;  %v3183_v44 = vand.u32 4294901760, %v202_v33  ;;  %v3228_v58 = vld [vmem:[%s3971_s1] sm:$0xff]  ;;  %v77_v62 = vld [vmem:[%s3972_s2 + $0x8] sm:$0xff] }
   0xb   :  { %2379 = vmatprep.subr.mxu0 %v3032_v3  ;;  %v3185_v45 = vand.u32 4294901760, %v81_v36  ;;  %v3188_v46 = vand.u32 4294901760, %v3154_v34  ;;  %v3191_v47 = vsub.f32 %v83_v19, %v3138_v28  ;;  %v3198_v49 = vand.u32 4294901760, %v80_v41  ;;  %v76_v13 = vld [vmem:[%s3972_s2] sm:$0xff]  ;;  %s3034_s2 = smov [#allocation2]  }
   0xc   :  { %2380 = vmatpush3.msra.mxu0 %v3083_v11  ;;  %2407 = vmatpush3.msra.mxu1 %v3163_v37  ;;  %3991 = vst [vmem:[#allocation5_spill] sm:$0xff] %v3183_v44  ;;  %v3205_v51 = vand.u32 4294901760, %v209_v39  ;;  %v223_v52 = vsub.f32 %v3144_v30, %v3170_v40  ;;  %v3210_v53 = vand.u32 4294901760, %v3179_v43  ;;  %v3216_v55 = vsub.f32 %v82_v26, %v3157_v35  ;;  %s2045_s19 = sshll.u32 %s3034_s2, 4  ;;  %s2046_s19 = int_to_ptr.vmem [resolvable:$true] %s2045_s19 }
   0xd   :  { %2381 = vmatprep.subr.mxu0 %v3032_v3  ;;  %2408 = vmatprep.subr.mxu1 %v3032_v3  ;;  %v3220_v56 = vand.u32 4294901760, %v216_v42  ;;  %v3223_v57 = vand.u32 4294901760, %v3191_v47  ;;  %v92_v59 = vmul.f32 %v74_v48, %v74_v48  ;;  %v230_v60 = vsub.f32 %v3154_v34, %v3188_v46  ;;  %s3010_s21 = scalar_lea.vmem %s2046_s19, 128  ;;  %p3015_p1 = scmp.lt.s32.totalorder %s2046_s19, %s2046_s19 }
   0xe   :  { %2382 = vmatpush3.msra.mxu0 %v3085_v12  ;;  %2409 = vmatpush3.msra.mxu1 %v3165_v38  ;;  %3992 = vst [vmem:[#allocation6_spill] sm:$0xff] %v3205_v51  ;;  %v3234_v61 = vand.u32 4294901760, %v79_v50  ;;  %v3240_v63 = vsub.f32 %v81_v36, %v3185_v45  ;;  %v3243_v0 = vmul.f32 %v3228_v58, %v74_v48  ;;  %v3247_v1 = vand.u32 4294901760, %v78_v54  ;;  %p3011_p0 = scmp.ne.s32.totalorder %s2046_s19, %s3010_s21  ;;  %p3016_p2 = scmp.lt.s32.totalorder %s3010_s21, %s3010_s21 }
   0xf   :  { %2383 = vmatprep.subr.mxu0 %v3032_v3  ;;  %2410 = vmatprep.subr.mxu1 %v3032_v3  ;;  %3993 = vst [vmem:[#allocation7_spill] sm:$0xff] %v3220_v56  ;;  %v3249_v2 = vand.u32 4294901760, %v92_v59  ;;  %v3253_v7 = vand.u32 4294901760, %v223_v52  ;;  %v237_v8 = vsub.f32 %v3179_v43, %v3210_v53  ;;  %v3258_v9 = vand.u32 4294901760, %v3216_v55 }
  0x10   :  { %2384 = vmatpush3.msra.mxu0 %v3104_v17  ;;  %2411 = vmatpush3.msra.mxu1 %v3183_v44  ;;  %3994 = vst [vmem:[#allocation8_spill] sm:$0xff] %v3243_v0  ;;  %v3264_v14 = vsub.f32 %v80_v41, %v3198_v49  ;;  %v244_v19 = vsub.f32 %v3191_v47, %v3223_v57  ;;  %v3270_v26 = vand.u32 4294901760, %v77_v62  ;;  %v3274_v31 = vand.u32 4294901760, %v230_v60  ;;  %p3017_p3 = por %p3016_p2, %p3015_p1 }
  0x11   :  { %2385 = vmatprep.subr.mxu0 %v3032_v3  ;;  %2412 = vmatprep.subr.mxu1 %v3032_v3  ;;  %3995 = vst [vmem:[#allocation9_spill] sm:$0xff] %v3253_v7  ;;  %v3277_v32 = vand.u32 4294901760, %v3240_v63  ;;  %v3280_v33 = vsub.f32 %v92_v59, %v3249_v2  ;;  %v3283_v36 = vsub.f32 %v79_v50, %v3234_v61  ;;  %v3287_v39 = vand.u32 4294901760, %v76_v13 }
  0x12   :  { %2386 = vmatpush3.msra.mxu0 %v3129_v25  ;;  %2413 = vmatpush3.msra.mxu1 %v3205_v51  ;;  %3996 = vst [vmem:[#allocation10_spill] sm:$0xff] %v3274_v31  ;;  %v3291_v41 = vand.u32 4294901760, %v237_v8  ;;  %v251_v42 = vsub.f32 %v3216_v55, %v3258_v9  ;;  %v3296_v48 = vand.u32 4294901760, %v3264_v14  ;;  %v3299_v50 = vsub.f32 %v78_v54, %v3247_v1  ;;  %p3018_p4 = pnand %p3017_p3, %p3011_p0 }
  0x13   :  { %2387 = vmatprep.subr.mxu0 %v3032_v3  ;;  %2414 = vmatprep.subr.mxu1 %v3032_v3  ;;  %v3303_v52 = vand.u32 4294901760, %v244_v19  ;;  %v258_v59 = vsub.f32 %v3240_v63, %v3277_v32  ;;  %v3311_v8 = vand.u32 4294901760, %v3283_v36  ;;  %v3314_v54 = vsub.f32 %v77_v62, %v3270_v26 }
  0x14   :  { %2388 = vmatpush3.msra.mxu0 %v3138_v28  ;;  %2415 = vmatpush3.msra.mxu1 %v3220_v56  ;;  %3997 = vst [vmem:[#allocation11_spill] sm:$0xff] %v3291_v41  ;;  %v3320_v19 = vand.u32 4294901760, %v251_v42  ;;  %v265_v0 = vsub.f32 %v3264_v14, %v3296_v48  ;;  %v3325_v60 = vand.u32 4294901760, %v3299_v50  ;;  %v4000_v42 = vand.u32 4294901760, %v3280_v33 }
  0x15   :  { %2389 = vmatprep.subr.mxu0 %v3032_v3  ;;  %2416 = vmatprep.subr.mxu1 %v3032_v3  ;;  %3998 = vst [vmem:[#allocation12_spill] sm:$0xff] %v3303_v52  ;;  %v3334_v62 = vand.u32 4294901760, %v258_v59  ;;  %vm2025_vm1 = vcmask 31744  }
  0x16   :  { %2390 = vmatpush3.msra.mxu0 %v3157_v35  ;;  %2417 = vmatpush3.msra.mxu1 %v3253_v7  ;;  %3999 = vst [vmem:[#allocation13_spill] sm:$0xff] %v3320_v19  ;;  %v272_v7 = vsub.f32 %v3283_v36, %v3311_v8  ;;  %v3348_v59 = vand.u32 4294901760, %v265_v0 }
  0x17   :  { %2391 = vmatprep.subr.mxu0 %v3032_v3  ;;  %2418 = vmatprep.subr.mxu1 %v3032_v3 }
  0x18   :  { %2392 = vmatpush3.msra.mxu0 %v3185_v45  ;;  %2419 = vmatpush3.msra.mxu1 %v3274_v31  ;;  %v3328_v31 = vsub.f32 %v76_v13, %v3287_v39  ;;  %v3342_v13 = vand.u32 4294901760, %v3314_v54  ;;  %v3359_v51 = vand.u32 4294901760, %v272_v7 }
  0x19   :  { %2393 = vmatprep.subr.mxu0 %v3032_v3  ;;  %2420 = vmatprep.subr.mxu1 %v3032_v3 }
  0x1a   :  { %2394 = vmatpush3.msra.mxu0 %v3198_v49  ;;  %2421 = vmatpush3.msra.mxu1 %v3291_v41  ;;  %v177_v41 = vsub.f32 %v3280_v33, %v4000_v42  ;;  %v3353_v42 = vand.u32 4294901760, %v3328_v31  ;;  %v286_v0 = vsub.f32 %v3314_v54, %v3342_v13 }
  0x1b   :  { %2395 = vmatprep.subr.mxu0 %v3032_v3  ;;  %2422 = vmatprep.subr.mxu1 %v3032_v3 }
  0x1c   :  { %2396 = vmatpush3.msra.mxu0 %v3234_v61  ;;  %2423 = vmatpush3.msra.mxu1 %v3303_v52  ;;  %v279_v52 = vsub.f32 %v3299_v50, %v3325_v60  ;;  %v178_v56 = vand.u32 4294901760, %v177_v41  ;;  %v293_v44 = vsub.f32 %v3328_v31, %v3353_v42  ;;  %v3374_v7 = vand.u32 4294901760, %v286_v0 }
  0x1d   :  { %2397 = vmatprep.subr.mxu0 %v3032_v3  ;;  %2424 = vmatprep.subr.mxu1 %v3032_v3 }
  0x1e   :  { %2398 = vmatpush3.msra.mxu0 %v3247_v1  ;;  %2425 = vmatpush3.msra.mxu1 %v3320_v19  ;;  %v3367_v19 = vand.u32 4294901760, %v279_v52  ;;  %v3380_v41 = vand.u32 4294901760, %v293_v44  ;;  %v4001_v44 = vand.u32 4294901760, %v3280_v33  ;;  %v4004_v52 = vld [vmem:[#allocation7_spill] sm:$0xff] }
  0x1f   :  { %2399 = vmatprep.subr.mxu0 %v3032_v3  ;;  %2426 = vmatprep.subr.mxu1 %v3032_v3 }
  0x20   :  { %2400 = vmatpush3.msra.mxu0 %v3270_v26  ;;  %2427 = vmatpush3.msra.mxu1 %v3334_v62 }
  0x21   :  { %2401 = vmatprep.subr.mxu0 %v3032_v3  ;;  %2428 = vmatprep.subr.mxu1 %v3032_v3 }
  0x22   :  { %2402 = vmatpush3.msra.mxu0 %v3287_v39  ;;  %2429 = vmatpush3.msra.mxu1 %v3348_v59 }
  0x23   :  { %2430 = vmatprep.subr.mxu1 %v3032_v3  ;;  %2441 = vmatprep.subr.mxu0 %v3032_v3 }
  0x24   :  { %2404 = vmatmul.mubr.f32.vlgmr.msra.gmra.mxu0 %v178_v56  ;;  %2431 = vmatpush3.msra.mxu1 %v3359_v51  ;;  %v734_v56 = vmul.f32 %v3228_v58, %v3228_v58  ;;  %v4003_v58 = vld [vmem:[#allocation6_spill] sm:$0xff] }
  0x25   :  { %2442 = vmatpush3.msra.mxu0 %v3099_v15  ;;  %2432 = vmatprep.subr.mxu1 %v3032_v3 }
  0x26   :  { %2443 = vmatprep.subr.mxu0 %v3032_v3  ;;  %2433 = vmatpush3.msra.mxu1 %v3367_v19 }
  0x27   :  { %2444 = vmatpush3.msra.mxu0 %v3102_v16  ;;  %2434 = vmatprep.subr.mxu1 %v3032_v3 }
  0x28   :  { %2445 = vmatprep.subr.mxu0 %v3032_v3  ;;  %2435 = vmatpush3.msra.mxu1 %v3374_v7 }
  0x29   :  { %2446 = vmatpush3.msra.mxu0 %v3107_v18  ;;  %2436 = vmatprep.subr.mxu1 %v3032_v3 }
  0x2a   :  { %2447 = vmatprep.subr.mxu0 %v3032_v3  ;;  %2437 = vmatpush3.msra.mxu1 %v3380_v41 }
  0x2b   :  { %2448 = vmatpush3.msra.mxu0 %v3114_v20  ;;  %2439 = vmatmul.mubr.f32.vlgmr.msra.gmra.mxu1 %v3249_v2 }
  0x2c   :  { %2449 = vmatprep.subr.mxu0 %v3032_v3  ;;  %2476 = vmatprep.subr.mxu1 %v3032_v3 }
  0x2d   :  { %2450 = vmatpush3.msra.mxu0 %v3117_v21  ;;  %2477 = vmatpush3.msra.mxu1 %v3065_v4 }
  0x2e   :  { %2451 = vmatprep.subr.mxu0 %v3032_v3  ;;  %2478 = vmatprep.subr.mxu1 %v3032_v3 }
  0x2f   :  { %2452 = vmatpush3.msra.mxu0 %v3144_v30  ;;  %2479 = vmatpush3.msra.mxu1 %v3067_v5 }
  0x30   :  { %2453 = vmatprep.subr.mxu0 %v3032_v3  ;;  %2480 = vmatprep.subr.mxu1 %v3032_v3 }
  0x31   :  { %2454 = vmatpush3.msra.mxu0 %v3154_v34  ;;  %2481 = vmatpush3.msra.mxu1 %v3069_v6 }
  0x32   :  { %2455 = vmatprep.subr.mxu0 %v3032_v3  ;;  %2482 = vmatprep.subr.mxu1 %v3032_v3 }
  0x33   :  { %2456 = vmatpush3.msra.mxu0 %v3179_v43  ;;  %2483 = vmatpush3.msra.mxu1 %v3081_v10 }
  0x34   :  { %2457 = vmatprep.subr.mxu0 %v3032_v3  ;;  %2484 = vmatprep.subr.mxu1 %v3032_v3 }
  0x35   :  { %2458 = vmatpush3.msra.mxu0 %v3191_v47  ;;  %2485 = vmatpush3.msra.mxu1 %v3083_v11 }
  0x36   :  { %2459 = vmatprep.subr.mxu0 %v3032_v3  ;;  %2486 = vmatprep.subr.mxu1 %v3032_v3 }
  0x37   :  { %2460 = vmatpush3.msra.mxu0 %v3216_v55  ;;  %2487 = vmatpush3.msra.mxu1 %v3085_v12 }
  0x38   :  { %2461 = vmatprep.subr.mxu0 %v3032_v3  ;;  %2488 = vmatprep.subr.mxu1 %v3032_v3 }
  0x39   :  { %2462 = vmatpush3.msra.mxu0 %v3240_v63  ;;  %2489 = vmatpush3.msra.mxu1 %v3104_v17 }
  0x3a   :  { %2463 = vmatprep.subr.mxu0 %v3032_v3  ;;  %2490 = vmatprep.subr.mxu1 %v3032_v3 }
  0x3b   :  { %2464 = vmatpush3.msra.mxu0 %v3264_v14  ;;  %2491 = vmatpush3.msra.mxu1 %v3129_v25 }
  0x3c   :  { %2465 = vmatprep.subr.mxu0 %v3032_v3  ;;  %2492 = vmatprep.subr.mxu1 %v3032_v3 }
  0x3d   :  { %2466 = vmatpush3.msra.mxu0 %v3283_v36  ;;  %2493 = vmatpush3.msra.mxu1 %v3138_v28 }
  0x3e   :  { %2467 = vmatprep.subr.mxu0 %v3032_v3  ;;  %2494 = vmatprep.subr.mxu1 %v3032_v3 }
  0x3f   :  { %2468 = vmatpush3.msra.mxu0 %v3299_v50  ;;  %2495 = vmatpush3.msra.mxu1 %v3157_v35 }
  0x40   :  { %2469 = vmatprep.subr.mxu0 %v3032_v3  ;;  %2496 = vmatprep.subr.mxu1 %v3032_v3 }
  0x41   :  { %2470 = vmatpush3.msra.mxu0 %v3314_v54  ;;  %2497 = vmatpush3.msra.mxu1 %v3185_v45 }
  0x42   :  { %2471 = vmatprep.subr.mxu0 %v3032_v3  ;;  %2498 = vmatprep.subr.mxu1 %v3032_v3 }
  0x43   :  { %2472 = vmatpush3.msra.mxu0 %v3328_v31  ;;  %2473 = vmatprep.mubr.msk.f32.mxu0 %vm3033_vm0, %v3032_v3 }
  0x44   :  { %2499 = vmatpush3.msra.mxu1 %v3198_v49  ;;  %2474 = vmatmul.mubr.f32.vlgmr.msra.gmra.mxu0 %v3280_v33  ;;  %v3547_v33 = vand.u32 4294901760, %v734_v56 }
  0x45   :  { %2500 = vmatprep.subr.mxu1 %v3032_v3  ;;  %2511 = vmatprep.subr.mxu0 %v3032_v3 }
  0x46   :  { %2501 = vmatpush3.msra.mxu1 %v3234_v61  ;;  %2512 = vmatpush3.msra.mxu0 %v3121_v22  ;;  %v3558_v0 = vsub.f32 %v734_v56, %v3547_v33  ;;  %v4007_v56 = vld [vmem:[#allocation11_spill] sm:$0xff] }
  0x47   :  { %2502 = vmatprep.subr.mxu1 %v3032_v3  ;;  %2513 = vmatprep.subr.mxu0 %v3032_v3 }
  0x48   :  { %2503 = vmatpush3.msra.mxu1 %v3247_v1  ;;  %2514 = vmatpush3.msra.mxu0 %v3124_v23 }
  0x49   :  { %2504 = vmatprep.subr.mxu1 %v3032_v3  ;;  %2515 = vmatprep.subr.mxu0 %v3032_v3 }
  0x4a   :  { %2505 = vmatpush3.msra.mxu1 %v3270_v26  ;;  %2516 = vmatpush3.msra.mxu0 %v3127_v24 }
  0x4b   :  { %2506 = vmatprep.subr.mxu1 %v3032_v3  ;;  %2517 = vmatprep.subr.mxu0 %v3032_v3 }
  0x4c   :  { %2507 = vmatpush3.msra.mxu1 %v3287_v39  ;;  %2508 = vmatprep.mubr.msk.f32.mxu1 %vm3033_vm0, %v3032_v3 }
  0x4d   :  { %2518 = vmatpush3.msra.mxu0 %v3136_v27  ;;  %2509 = vmatmul.mubr.f32.vlgmr.msra.gmra.mxu1 %v4001_v44  ;;  %v4005_v44 = vld [vmem:[#allocation9_spill] sm:$0xff] }
  0x4e   :  { %2519 = vmatprep.subr.mxu0 %v3032_v3  ;;  %2546 = vmatprep.subr.mxu1 %v3032_v3 }
  0x4f   :  { %2520 = vmatpush3.msra.mxu0 %v3141_v29  ;;  %2547 = vmatpush3.msra.mxu1 %v3065_v4 }
  0x50   :  { %2521 = vmatprep.subr.mxu0 %v3032_v3  ;;  %2548 = vmatprep.subr.mxu1 %v3032_v3 }
  0x51   :  { %2522 = vmatpush3.msra.mxu0 %v3170_v40  ;;  %2549 = vmatpush3.msra.mxu1 %v3067_v5 }
  0x52   :  { %2523 = vmatprep.subr.mxu0 %v3032_v3  ;;  %2550 = vmatprep.subr.mxu1 %v3032_v3 }
  0x53   :  { %2524 = vmatpush3.msra.mxu0 %v3188_v46  ;;  %2551 = vmatpush3.msra.mxu1 %v3069_v6 }
  0x54   :  { %2525 = vmatprep.subr.mxu0 %v3032_v3  ;;  %2552 = vmatprep.subr.mxu1 %v3032_v3 }
  0x55   :  { %2526 = vmatpush3.msra.mxu0 %v3210_v53  ;;  %2553 = vmatpush3.msra.mxu1 %v3081_v10 }
  0x56   :  { %2527 = vmatprep.subr.mxu0 %v3032_v3  ;;  %2554 = vmatprep.subr.mxu1 %v3032_v3 }
  0x57   :  { %2528 = vmatpush3.msra.mxu0 %v3223_v57  ;;  %2555 = vmatpush3.msra.mxu1 %v3083_v11 }
  0x58   :  { %2529 = vmatprep.subr.mxu0 %v3032_v3  ;;  %2556 = vmatprep.subr.mxu1 %v3032_v3 }
  0x59   :  { %2530 = vmatpush3.msra.mxu0 %v3258_v9  ;;  %2557 = vmatpush3.msra.mxu1 %v3085_v12 }
  0x5a   :  { %2531 = vmatprep.subr.mxu0 %v3032_v3  ;;  %2558 = vmatprep.subr.mxu1 %v3032_v3 }
  0x5b   :  { %2532 = vmatpush3.msra.mxu0 %v3277_v32  ;;  %2559 = vmatpush3.msra.mxu1 %v3104_v17 }
  0x5c   :  { %2533 = vmatprep.subr.mxu0 %v3032_v3  ;;  %2560 = vmatprep.subr.mxu1 %v3032_v3 }
  0x5d   :  { %2534 = vmatpush3.msra.mxu0 %v3296_v48  ;;  %2561 = vmatpush3.msra.mxu1 %v3129_v25 }
  0x5e   :  { %2535 = vmatprep.subr.mxu0 %v3032_v3  ;;  %2562 = vmatprep.subr.mxu1 %v3032_v3 }
  0x5f   :  { %2536 = vmatpush3.msra.mxu0 %v3311_v8  ;;  %2563 = vmatpush3.msra.mxu1 %v3138_v28 }
  0x60   :  { %2537 = vmatprep.subr.mxu0 %v3032_v3  ;;  %2564 = vmatprep.subr.mxu1 %v3032_v3 }
  0x61   :  { %2538 = vmatpush3.msra.mxu0 %v3325_v60  ;;  %2565 = vmatpush3.msra.mxu1 %v3157_v35 }
  0x62   :  { %2539 = vmatprep.subr.mxu0 %v3032_v3  ;;  %2566 = vmatprep.subr.mxu1 %v3032_v3 }
  0x63   :  { %2540 = vmatpush3.msra.mxu0 %v3342_v13  ;;  %2567 = vmatpush3.msra.mxu1 %v3185_v45 }
  0x64   :  { %2541 = vmatprep.subr.mxu0 %v3032_v3  ;;  %2568 = vmatprep.subr.mxu1 %v3032_v3 }
  0x65   :  { %2542 = vmatpush3.msra.mxu0 %v3353_v42  ;;  %2543 = vmatprep.mubr.msk.f32.mxu0 %vm3033_vm0, %v3032_v3 }
  0x66   :  { %2569 = vmatpush3.msra.mxu1 %v3198_v49  ;;  %2544 = vmatmul.mubr.f32.vlgmr.msra.gmra.mxu0 %v3249_v2 }
  0x67   :  { %2570 = vmatprep.subr.mxu1 %v3032_v3  ;;  %2581 = vmatprep.subr.mxu0 %v3032_v3 }
  0x68   :  { %2571 = vmatpush3.msra.mxu1 %v3234_v61  ;;  %2582 = vmatpush3.msra.mxu0 %v3065_v4 }
  0x69   :  { %2572 = vmatprep.subr.mxu1 %v3032_v3  ;;  %2583 = vmatprep.subr.mxu0 %v3032_v3 }
  0x6a   :  { %2573 = vmatpush3.msra.mxu1 %v3247_v1  ;;  %2584 = vmatpush3.msra.mxu0 %v3067_v5 }
  0x6b   :  { %2574 = vmatprep.subr.mxu1 %v3032_v3  ;;  %2585 = vmatprep.subr.mxu0 %v3032_v3 }
  0x6c   :  { %2575 = vmatpush3.msra.mxu1 %v3270_v26  ;;  %2586 = vmatpush3.msra.mxu0 %v3069_v6 }
  0x6d   :  { %2576 = vmatprep.subr.mxu1 %v3032_v3  ;;  %2587 = vmatprep.subr.mxu0 %v3032_v3 }
  0x6e   :  { %2577 = vmatpush3.msra.mxu1 %v3287_v39  ;;  %2578 = vmatprep.mubr.msk.f32.mxu1 %vm3033_vm0, %v3032_v3 }
  0x6f   :  { %2588 = vmatpush3.msra.mxu0 %v3081_v10  ;;  %2579 = vmatmul.mubr.f32.vlgmr.msra.gmra.mxu1 %v3249_v2  ;;  %v4002_v2 = vld [vmem:[#allocation5_spill] sm:$0xff] }
  0x70   :  { %2589 = vmatprep.subr.mxu0 %v3032_v3  ;;  %2616 = vmatprep.subr.mxu1 %v3032_v3 }
  0x71   :  { %2590 = vmatpush3.msra.mxu0 %v3083_v11  ;;  %2617 = vmatpush3.msra.mxu1 %v3163_v37 }
  0x72   :  { %2591 = vmatprep.subr.mxu0 %v3032_v3  ;;  %2618 = vmatprep.subr.mxu1 %v3032_v3 }
  0x73   :  { %2592 = vmatpush3.msra.mxu0 %v3085_v12  ;;  %2619 = vmatpush3.msra.mxu1 %v3165_v38 }
  0x74   :  { %2593 = vmatprep.subr.mxu0 %v3032_v3  ;;  %2620 = vmatprep.subr.mxu1 %v3032_v3 }
  0x75   :  { %2594 = vmatpush3.msra.mxu0 %v3104_v17  ;;  %2621 = vmatpush3.msra.mxu1 %v4002_v2  ;;  %v4009_v2 = vld [vmem:[#allocation13_spill] sm:$0xff] }
  0x76   :  { %2595 = vmatprep.subr.mxu0 %v3032_v3  ;;  %2622 = vmatprep.subr.mxu1 %v3032_v3 }
  0x77   :  { %2596 = vmatpush3.msra.mxu0 %v3129_v25  ;;  %2623 = vmatpush3.msra.mxu1 %v4003_v58  ;;  %v4006_v58 = vld [vmem:[#allocation10_spill] sm:$0xff] }
  0x78   :  { %2597 = vmatprep.subr.mxu0 %v3032_v3  ;;  %2624 = vmatprep.subr.mxu1 %v3032_v3 }
  0x79   :  { %2598 = vmatpush3.msra.mxu0 %v3138_v28  ;;  %2625 = vmatpush3.msra.mxu1 %v4004_v52  ;;  %v818_v52 = vand.u32 4294901760, %v3558_v0 }
  0x7a   :  { %2599 = vmatprep.subr.mxu0 %v3032_v3  ;;  %2626 = vmatprep.subr.mxu1 %v3032_v3 }
  0x7b   :  { %2600 = vmatpush3.msra.mxu0 %v3157_v35  ;;  %2627 = vmatpush3.msra.mxu1 %v4005_v44  ;;  %v4008_v44 = vld [vmem:[#allocation12_spill] sm:$0xff] }
  0x7c   :  { %2601 = vmatprep.subr.mxu0 %v3032_v3  ;;  %2628 = vmatprep.subr.mxu1 %v3032_v3 }
  0x7d   :  { %2602 = vmatpush3.msra.mxu0 %v3185_v45  ;;  %2629 = vmatpush3.msra.mxu1 %v4006_v58  ;;  %v819_v58 = vsub.f32 %v3558_v0, %v818_v52 }
  0x7e   :  { %2603 = vmatprep.subr.mxu0 %v3032_v3  ;;  %2630 = vmatprep.subr.mxu1 %v3032_v3 }
  0x7f   :  { %2604 = vmatpush3.msra.mxu0 %v3198_v49  ;;  %2631 = vmatpush3.msra.mxu1 %v4007_v56 }
  0x80   :  { %2605 = vmatprep.subr.mxu0 %v3032_v3  ;;  %2632 = vmatprep.subr.mxu1 %v3032_v3 }
  0x81   :  { %2606 = vmatpush3.msra.mxu0 %v3234_v61  ;;  %2633 = vmatpush3.msra.mxu1 %v4008_v44  ;;  %v820_v44 = vand.u32 4294901760, %v819_v58 }
  0x82   :  { %2607 = vmatprep.subr.mxu0 %v3032_v3  ;;  %2634 = vmatprep.subr.mxu1 %v3032_v3 }
  0x83   :  { %2608 = vmatpush3.msra.mxu0 %v3247_v1  ;;  %2635 = vmatpush3.msra.mxu1 %v4009_v2 }
  0x84   :  { %2609 = vmatprep.subr.mxu0 %v3032_v3  ;;  %2636 = vmatprep.subr.mxu1 %v3032_v3 }
  0x85   :  { %2610 = vmatpush3.msra.mxu0 %v3270_v26  ;;  %2637 = vmatpush3.msra.mxu1 %v3334_v62 }
  0x86   :  { %2611 = vmatprep.subr.mxu0 %v3032_v3  ;;  %2638 = vmatprep.subr.mxu1 %v3032_v3 }
  0x87   :  { %2612 = vmatpush3.msra.mxu0 %v3287_v39  ;;  %2639 = vmatpush3.msra.mxu1 %v3348_v59 }
  0x88   :  { %2613 = vmatprep.mubr.msk.f32.mxu0 %vm3033_vm0, %v3032_v3  ;;  %2640 = vmatprep.subr.mxu1 %v3032_v3 }
  0x89   :  { %2651 = vmatprep.subr.mxu0 %v3032_v3  ;;  %2614 = vmatmul.mubr.f32.vlgmr.msra.gmra.mxu0 %v820_v44  ;;  %v4014_v44 = vld [vmem:[#allocation9_spill] sm:$0xff] }
  0x8a   :  { %2641 = vmatpush3.msra.mxu1 %v3359_v51  ;;  %2652 = vmatpush3.msra.mxu0 %v3099_v15 }
  0x8b   :  { %2642 = vmatprep.subr.mxu1 %v3032_v3  ;;  %2653 = vmatprep.subr.mxu0 %v3032_v3 }
  0x8c   :  { %2643 = vmatpush3.msra.mxu1 %v3367_v19  ;;  %2654 = vmatpush3.msra.mxu0 %v3102_v16 }
  0x8d   :  { %2644 = vmatprep.subr.mxu1 %v3032_v3  ;;  %2655 = vmatprep.subr.mxu0 %v3032_v3 }
  0x8e   :  { %2645 = vmatpush3.msra.mxu1 %v3374_v7  ;;  %2656 = vmatpush3.msra.mxu0 %v3107_v18 }
  0x8f   :  { %2646 = vmatprep.subr.mxu1 %v3032_v3  ;;  %2657 = vmatprep.subr.mxu0 %v3032_v3 }
  0x90   :  { %2647 = vmatpush3.msra.mxu1 %v3380_v41  ;;  %2648 = vmatprep.mubr.msk.f32.mxu1 %vm3033_vm0, %v3032_v3 }
  0x91   :  { %2658 = vmatpush3.msra.mxu0 %v3114_v20  ;;  %2649 = vmatmul.mubr.f32.vlgmr.msra.gmra.mxu1 %v3547_v33 }
  0x92   :  { %2659 = vmatprep.subr.mxu0 %v3032_v3  ;;  %2686 = vmatprep.subr.mxu1 %v3032_v3 }
  0x93   :  { %2660 = vmatpush3.msra.mxu0 %v3117_v21  ;;  %2687 = vmatpush3.msra.mxu1 %v3065_v4 }
  0x94   :  { %2661 = vmatprep.subr.mxu0 %v3032_v3  ;;  %2688 = vmatprep.subr.mxu1 %v3032_v3 }
  0x95   :  { %2662 = vmatpush3.msra.mxu0 %v3144_v30  ;;  %2689 = vmatpush3.msra.mxu1 %v3067_v5 }
  0x96   :  { %2663 = vmatprep.subr.mxu0 %v3032_v3  ;;  %2690 = vmatprep.subr.mxu1 %v3032_v3 }
  0x97   :  { %2664 = vmatpush3.msra.mxu0 %v3154_v34  ;;  %2691 = vmatpush3.msra.mxu1 %v3069_v6 }
  0x98   :  { %2665 = vmatprep.subr.mxu0 %v3032_v3  ;;  %2692 = vmatprep.subr.mxu1 %v3032_v3 }
  0x99   :  { %2666 = vmatpush3.msra.mxu0 %v3179_v43  ;;  %2693 = vmatpush3.msra.mxu1 %v3081_v10 }
  0x9a   :  { %2667 = vmatprep.subr.mxu0 %v3032_v3  ;;  %2694 = vmatprep.subr.mxu1 %v3032_v3 }
  0x9b   :  { %2668 = vmatpush3.msra.mxu0 %v3191_v47  ;;  %2695 = vmatpush3.msra.mxu1 %v3083_v11 }
  0x9c   :  { %2669 = vmatprep.subr.mxu0 %v3032_v3  ;;  %2696 = vmatprep.subr.mxu1 %v3032_v3 }
  0x9d   :  { %2670 = vmatpush3.msra.mxu0 %v3216_v55  ;;  %2697 = vmatpush3.msra.mxu1 %v3085_v12 }
  0x9e   :  { %2671 = vmatprep.subr.mxu0 %v3032_v3  ;;  %2698 = vmatprep.subr.mxu1 %v3032_v3 }
  0x9f   :  { %2672 = vmatpush3.msra.mxu0 %v3240_v63  ;;  %2699 = vmatpush3.msra.mxu1 %v3104_v17 }
  0xa0   :  { %2673 = vmatprep.subr.mxu0 %v3032_v3  ;;  %2700 = vmatprep.subr.mxu1 %v3032_v3 }
  0xa1   :  { %2674 = vmatpush3.msra.mxu0 %v3264_v14  ;;  %2701 = vmatpush3.msra.mxu1 %v3129_v25 }
  0xa2   :  { %2675 = vmatprep.subr.mxu0 %v3032_v3  ;;  %2702 = vmatprep.subr.mxu1 %v3032_v3 }
  0xa3   :  { %2676 = vmatpush3.msra.mxu0 %v3283_v36  ;;  %2703 = vmatpush3.msra.mxu1 %v3138_v28 }
  0xa4   :  { %2677 = vmatprep.subr.mxu0 %v3032_v3  ;;  %2704 = vmatprep.subr.mxu1 %v3032_v3 }
  0xa5   :  { %2678 = vmatpush3.msra.mxu0 %v3299_v50  ;;  %2705 = vmatpush3.msra.mxu1 %v3157_v35 }
  0xa6   :  { %2679 = vmatprep.subr.mxu0 %v3032_v3  ;;  %2706 = vmatprep.subr.mxu1 %v3032_v3 }
  0xa7   :  { %2680 = vmatpush3.msra.mxu0 %v3314_v54  ;;  %2707 = vmatpush3.msra.mxu1 %v3185_v45 }
  0xa8   :  { %2681 = vmatprep.subr.mxu0 %v3032_v3  ;;  %2708 = vmatprep.subr.mxu1 %v3032_v3 }
  0xa9   :  { %2682 = vmatpush3.msra.mxu0 %v3328_v31  ;;  %2683 = vmatprep.mubr.msk.f32.mxu0 %vm3033_vm0, %v3032_v3 }
  0xaa   :  { %2709 = vmatpush3.msra.mxu1 %v3198_v49  ;;  %2684 = vmatmul.mubr.f32.vlgmr.msra.gmra.mxu0 %v3558_v0 }
  0xab   :  { %2710 = vmatprep.subr.mxu1 %v3032_v3  ;;  %2721 = vmatprep.subr.mxu0 %v3032_v3 }
  0xac   :  { %2711 = vmatpush3.msra.mxu1 %v3234_v61  ;;  %2722 = vmatpush3.msra.mxu0 %v3121_v22 }
  0xad   :  { %2712 = vmatprep.subr.mxu1 %v3032_v3  ;;  %2723 = vmatprep.subr.mxu0 %v3032_v3 }
  0xae   :  { %2713 = vmatpush3.msra.mxu1 %v3247_v1  ;;  %2724 = vmatpush3.msra.mxu0 %v3124_v23 }
  0xaf   :  { %2714 = vmatprep.subr.mxu1 %v3032_v3  ;;  %2725 = vmatprep.subr.mxu0 %v3032_v3 }
  0xb0   :  { %2715 = vmatpush3.msra.mxu1 %v3270_v26  ;;  %2726 = vmatpush3.msra.mxu0 %v3127_v24 }
  0xb1   :  { %2716 = vmatprep.subr.mxu1 %v3032_v3  ;;  %2727 = vmatprep.subr.mxu0 %v3032_v3 }
  0xb2   :  { %2717 = vmatpush3.msra.mxu1 %v3287_v39  ;;  %2718 = vmatprep.mubr.msk.f32.mxu1 %vm3033_vm0, %v3032_v3 }
  0xb3   :  { %2728 = vmatpush3.msra.mxu0 %v3136_v27  ;;  %2719 = vmatmul.mubr.f32.vlgmr.msra.gmra.mxu1 %v818_v52  ;;  %v4011_v52 = vld [vmem:[#allocation5_spill] sm:$0xff] }
  0xb4   :  { %2729 = vmatprep.subr.mxu0 %v3032_v3  ;;  %2756 = vmatprep.subr.mxu1 %v3032_v3 }
  0xb5   :  { %2730 = vmatpush3.msra.mxu0 %v3141_v29  ;;  %2757 = vmatpush3.msra.mxu1 %v3065_v4 }
  0xb6   :  { %2731 = vmatprep.subr.mxu0 %v3032_v3  ;;  %2758 = vmatprep.subr.mxu1 %v3032_v3 }
  0xb7   :  { %2732 = vmatpush3.msra.mxu0 %v3170_v40  ;;  %2759 = vmatpush3.msra.mxu1 %v3067_v5 }
  0xb8   :  { %2733 = vmatprep.subr.mxu0 %v3032_v3  ;;  %2760 = vmatprep.subr.mxu1 %v3032_v3 }
  0xb9   :  { %2734 = vmatpush3.msra.mxu0 %v3188_v46  ;;  %2761 = vmatpush3.msra.mxu1 %v3069_v6 }
  0xba   :  { %2735 = vmatprep.subr.mxu0 %v3032_v3  ;;  %2762 = vmatprep.subr.mxu1 %v3032_v3 }
  0xbb   :  { %2736 = vmatpush3.msra.mxu0 %v3210_v53  ;;  %2763 = vmatpush3.msra.mxu1 %v3081_v10 }
  0xbc   :  { %2737 = vmatprep.subr.mxu0 %v3032_v3  ;;  %2764 = vmatprep.subr.mxu1 %v3032_v3 }
  0xbd   :  { %2738 = vmatpush3.msra.mxu0 %v3223_v57  ;;  %2765 = vmatpush3.msra.mxu1 %v3083_v11 }
  0xbe   :  { %2739 = vmatprep.subr.mxu0 %v3032_v3  ;;  %2766 = vmatprep.subr.mxu1 %v3032_v3 }
  0xbf   :  { %2740 = vmatpush3.msra.mxu0 %v3258_v9  ;;  %2767 = vmatpush3.msra.mxu1 %v3085_v12 }
  0xc0   :  { %2741 = vmatprep.subr.mxu0 %v3032_v3  ;;  %2768 = vmatprep.subr.mxu1 %v3032_v3 }
  0xc1   :  { %2742 = vmatpush3.msra.mxu0 %v3277_v32  ;;  %2769 = vmatpush3.msra.mxu1 %v3104_v17 }
  0xc2   :  { %2743 = vmatprep.subr.mxu0 %v3032_v3  ;;  %2770 = vmatprep.subr.mxu1 %v3032_v3 }
  0xc3   :  { %2744 = vmatpush3.msra.mxu0 %v3296_v48  ;;  %2771 = vmatpush3.msra.mxu1 %v3129_v25 }
  0xc4   :  { %2745 = vmatprep.subr.mxu0 %v3032_v3  ;;  %2772 = vmatprep.subr.mxu1 %v3032_v3 }
  0xc5   :  { %2746 = vmatpush3.msra.mxu0 %v3311_v8  ;;  %2773 = vmatpush3.msra.mxu1 %v3138_v28 }
  0xc6   :  { %2747 = vmatprep.subr.mxu0 %v3032_v3  ;;  %2774 = vmatprep.subr.mxu1 %v3032_v3 }
  0xc7   :  { %2748 = vmatpush3.msra.mxu0 %v3325_v60  ;;  %2775 = vmatpush3.msra.mxu1 %v3157_v35 }
  0xc8   :  { %2749 = vmatprep.subr.mxu0 %v3032_v3  ;;  %2776 = vmatprep.subr.mxu1 %v3032_v3 }
  0xc9   :  { %2750 = vmatpush3.msra.mxu0 %v3342_v13  ;;  %2777 = vmatpush3.msra.mxu1 %v3185_v45 }
  0xca   :  { %2751 = vmatprep.subr.mxu0 %v3032_v3  ;;  %2778 = vmatprep.subr.mxu1 %v3032_v3 }
  0xcb   :  { %2752 = vmatpush3.msra.mxu0 %v3353_v42  ;;  %2753 = vmatprep.mubr.msk.f32.mxu0 %vm3033_vm0, %v3032_v3 }
  0xcc   :  { %2779 = vmatpush3.msra.mxu1 %v3198_v49  ;;  %2754 = vmatmul.mubr.f32.vlgmr.msra.gmra.mxu0 %v3547_v33 }
  0xcd   :  { %2780 = vmatprep.subr.mxu1 %v3032_v3  ;;  %2791 = vmatprep.subr.mxu0 %v3032_v3 }
  0xce   :  { %2781 = vmatpush3.msra.mxu1 %v3234_v61  ;;  %2792 = vmatpush3.msra.mxu0 %v3065_v4 }
  0xcf   :  { %2782 = vmatprep.subr.mxu1 %v3032_v3  ;;  %2793 = vmatprep.subr.mxu0 %v3032_v3 }
  0xd0   :  { %2783 = vmatpush3.msra.mxu1 %v3247_v1  ;;  %2794 = vmatpush3.msra.mxu0 %v3067_v5 }
  0xd1   :  { %2784 = vmatprep.subr.mxu1 %v3032_v3  ;;  %2795 = vmatprep.subr.mxu0 %v3032_v3 }
  0xd2   :  { %2785 = vmatpush3.msra.mxu1 %v3270_v26  ;;  %2796 = vmatpush3.msra.mxu0 %v3069_v6 }
  0xd3   :  { %2786 = vmatprep.subr.mxu1 %v3032_v3  ;;  %2797 = vmatprep.subr.mxu0 %v3032_v3 }
  0xd4   :  { %2787 = vmatpush3.msra.mxu1 %v3287_v39  ;;  %2788 = vmatprep.mubr.msk.f32.mxu1 %vm3033_vm0, %v3032_v3 }
  0xd5   :  { %2798 = vmatpush3.msra.mxu0 %v3081_v10  ;;  %2789 = vmatmul.mubr.f32.vlgmr.msra.gmra.mxu1 %v3547_v33  ;;  %v4010_v33 = vld [vmem:[#allocation8_spill] sm:$0xff] }
  0xd6   :  { %2799 = vmatprep.subr.mxu0 %v3032_v3  ;;  %2826 = vmatprep.subr.mxu1 %v3032_v3  ;;  %v3765_v58 = vand.u32 4294901760, %v4010_v33 }
  0xd7   :  { %2800 = vmatpush3.msra.mxu0 %v3083_v11  ;;  %2827 = vmatpush3.msra.mxu1 %v3163_v37  ;;  %v4012_v37 = vld [vmem:[#allocation6_spill] sm:$0xff] }
  0xd8   :  { %2801 = vmatprep.subr.mxu0 %v3032_v3  ;;  %2828 = vmatprep.subr.mxu1 %v3032_v3  ;;  %v3779_v0 = vsub.f32 %v4010_v33, %v3765_v58 }
  0xd9   :  { %2802 = vmatpush3.msra.mxu0 %v3085_v12  ;;  %2829 = vmatpush3.msra.mxu1 %v3165_v38  ;;  %v4013_v38 = vld [vmem:[#allocation7_spill] sm:$0xff] }
  0xda   :  { %2803 = vmatprep.subr.mxu0 %v3032_v3  ;;  %2830 = vmatprep.subr.mxu1 %v3032_v3 }
  0xdb   :  { %2804 = vmatpush3.msra.mxu0 %v3104_v17  ;;  %2831 = vmatpush3.msra.mxu1 %v4011_v52  ;;  %v4015_v52 = vld [vmem:[#allocation10_spill] sm:$0xff] }
  0xdc   :  { %2805 = vmatprep.subr.mxu0 %v3032_v3  ;;  %2832 = vmatprep.subr.mxu1 %v3032_v3 }
  0xdd   :  { %2806 = vmatpush3.msra.mxu0 %v3129_v25  ;;  %2833 = vmatpush3.msra.mxu1 %v4012_v37  ;;  %v1460_v37 = vand.u32 4294901760, %v3779_v0 }
  0xde   :  { %2807 = vmatprep.subr.mxu0 %v3032_v3  ;;  %2834 = vmatprep.subr.mxu1 %v3032_v3 }
  0xdf   :  { %2808 = vmatpush3.msra.mxu0 %v3138_v28  ;;  %2835 = vmatpush3.msra.mxu1 %v4013_v38 }
  0xe0   :  { %2809 = vmatprep.subr.mxu0 %v3032_v3  ;;  %2836 = vmatprep.subr.mxu1 %v3032_v3 }
  0xe1   :  { %2810 = vmatpush3.msra.mxu0 %v3157_v35  ;;  %2837 = vmatpush3.msra.mxu1 %v4014_v44  ;;  %v4016_v44 = vld [vmem:[#allocation12_spill] sm:$0xff] }
  0xe2   :  { %2811 = vmatprep.subr.mxu0 %v3032_v3  ;;  %2838 = vmatprep.subr.mxu1 %v3032_v3 }
  0xe3   :  { %2812 = vmatpush3.msra.mxu0 %v3185_v45  ;;  %2839 = vmatpush3.msra.mxu1 %v4015_v52  ;;  %v1461_v52 = vsub.f32 %v3779_v0, %v1460_v37 }
  0xe4   :  { %2813 = vmatprep.subr.mxu0 %v3032_v3  ;;  %2840 = vmatprep.subr.mxu1 %v3032_v3  ;;  %v180_v33 = vpop.f32.mrf.mxu0 }
  0xe5   :  { %2814 = vmatpush3.msra.mxu0 %v3198_v49  ;;  %2841 = vmatpush3.msra.mxu1 %v4007_v56  ;;  %v1462_v56 = vand.u32 4294901760, %v1461_v52 }
  0xe6   :  { %2815 = vmatprep.subr.mxu0 %v3032_v3  ;;  %2842 = vmatprep.subr.mxu1 %v3032_v3  ;;  %v2405_v38 = vpop.f32.mrf.mxu0 }
  0xe7   :  { %2816 = vmatpush3.msra.mxu0 %v3234_v61  ;;  %2843 = vmatpush3.msra.mxu1 %v4016_v44 }
  0xe8   :  { %2817 = vmatprep.subr.mxu0 %v3032_v3  ;;  %2844 = vmatprep.subr.mxu1 %v3032_v3 }
  0xe9   :  { %2818 = vmatpush3.msra.mxu0 %v3247_v1  ;;  %2845 = vmatpush3.msra.mxu1 %v4009_v2 }
  0xea   :  { %2819 = vmatprep.subr.mxu0 %v3032_v3  ;;  %2846 = vmatprep.subr.mxu1 %v3032_v3 }
  0xeb   :  { %2820 = vmatpush3.msra.mxu0 %v3270_v26  ;;  %2847 = vmatpush3.msra.mxu1 %v3334_v62  ;;  %v331_v38 = vpop.f32.mrf.mxu1 }
  0xec   :  { %2821 = vmatprep.subr.mxu0 %v3032_v3  ;;  %2848 = vmatprep.subr.mxu1 %v3032_v3  ;;  %v332_v44 = vadd.f32 %v331_v38, %v180_v33 }
  0xed   :  { %2822 = vmatpush3.msra.mxu0 %v3287_v39  ;;  %2849 = vmatpush3.msra.mxu1 %v3348_v59  ;;  %v2440_v2 = vpop.f32.mrf.mxu1 }
  0xee   :  { %2823 = vmatprep.mubr.msk.f32.mxu0 %vm3033_vm0, %v3032_v3  ;;  %2850 = vmatprep.subr.mxu1 %v3032_v3 }
  0xef   :  { %2861 = vmatprep.subr.mxu0 %v3032_v3  ;;  %2824 = vmatmul.mubr.f32.vlgmr.msra.gmra.mxu0 %v1462_v56 }
  0xf0   :  { %2851 = vmatpush3.msra.mxu1 %v3359_v51  ;;  %2862 = vmatpush3.msra.mxu0 %v3099_v15 }
  0xf1   :  { %2852 = vmatprep.subr.mxu1 %v3032_v3  ;;  %2863 = vmatprep.subr.mxu0 %v3032_v3 }
  0xf2   :  { %2853 = vmatpush3.msra.mxu1 %v3367_v19  ;;  %2864 = vmatpush3.msra.mxu0 %v3102_v16 }
  0xf3   :  { %2854 = vmatprep.subr.mxu1 %v3032_v3  ;;  %2865 = vmatprep.subr.mxu0 %v3032_v3 }
  0xf4   :  { %2855 = vmatpush3.msra.mxu1 %v3374_v7  ;;  %2866 = vmatpush3.msra.mxu0 %v3107_v18 }
  0xf5   :  { %2856 = vmatprep.subr.mxu1 %v3032_v3  ;;  %2867 = vmatprep.subr.mxu0 %v3032_v3 }
  0xf6   :  { %2857 = vmatpush3.msra.mxu1 %v3380_v41  ;;  %2858 = vmatprep.mubr.msk.f32.mxu1 %vm3033_vm0, %v3032_v3 }
  0xf7   :  { %2868 = vmatpush3.msra.mxu0 %v3114_v20  ;;  %2859 = vmatmul.mubr.f32.vlgmr.msra.gmra.mxu1 %v3765_v58 }
  0xf8   :  { %2869 = vmatprep.subr.mxu0 %v3032_v3  ;;  %2896 = vmatprep.subr.mxu1 %v3032_v3 }
  0xf9   :  { %2870 = vmatpush3.msra.mxu0 %v3117_v21  ;;  %2897 = vmatpush3.msra.mxu1 %v3065_v4 }
  0xfa   :  { %2871 = vmatprep.subr.mxu0 %v3032_v3  ;;  %2898 = vmatprep.subr.mxu1 %v3032_v3 }
  0xfb   :  { %2872 = vmatpush3.msra.mxu0 %v3144_v30  ;;  %2899 = vmatpush3.msra.mxu1 %v3067_v5 }
  0xfc   :  { %2873 = vmatprep.subr.mxu0 %v3032_v3  ;;  %2900 = vmatprep.subr.mxu1 %v3032_v3 }
  0xfd   :  { %2874 = vmatpush3.msra.mxu0 %v3154_v34  ;;  %2901 = vmatpush3.msra.mxu1 %v3069_v6 }
  0xfe   :  { %2875 = vmatprep.subr.mxu0 %v3032_v3  ;;  %2902 = vmatprep.subr.mxu1 %v3032_v3 }
  0xff   :  { %2876 = vmatpush3.msra.mxu0 %v3179_v43  ;;  %2903 = vmatpush3.msra.mxu1 %v3081_v10 }
 0x100   :  { %2877 = vmatprep.subr.mxu0 %v3032_v3  ;;  %2904 = vmatprep.subr.mxu1 %v3032_v3 }
 0x101   :  { %2878 = vmatpush3.msra.mxu0 %v3191_v47  ;;  %2905 = vmatpush3.msra.mxu1 %v3083_v11 }
 0x102   :  { %2879 = vmatprep.subr.mxu0 %v3032_v3  ;;  %2906 = vmatprep.subr.mxu1 %v3032_v3 }
 0x103   :  { %2880 = vmatpush3.msra.mxu0 %v3216_v55  ;;  %2907 = vmatpush3.msra.mxu1 %v3085_v12 }
 0x104   :  { %2881 = vmatprep.subr.mxu0 %v3032_v3  ;;  %2908 = vmatprep.subr.mxu1 %v3032_v3  ;;  %v435_v15 = vpop.f32.mrf.mxu0 }
 0x105   :  { %2882 = vmatpush3.msra.mxu0 %v3240_v63  ;;  %2909 = vmatpush3.msra.mxu1 %v3104_v17  ;;  %v436_v16 = vadd.f32 %v435_v15, %v332_v44 }
 0x106   :  { %2883 = vmatprep.subr.mxu0 %v3032_v3  ;;  %2910 = vmatprep.subr.mxu1 %v3032_v3  ;;  %v2475_v18 = vpop.f32.mrf.mxu0 }
 0x107   :  { %2884 = vmatpush3.msra.mxu0 %v3264_v14  ;;  %2911 = vmatpush3.msra.mxu1 %v3129_v25 }
 0x108   :  { %2885 = vmatprep.subr.mxu0 %v3032_v3  ;;  %2912 = vmatprep.subr.mxu1 %v3032_v3 }
 0x109   :  { %2886 = vmatpush3.msra.mxu0 %v3283_v36  ;;  %2913 = vmatpush3.msra.mxu1 %v3138_v28 }
 0x10a   :  { %2887 = vmatprep.subr.mxu0 %v3032_v3  ;;  %2914 = vmatprep.subr.mxu1 %v3032_v3 }
 0x10b   :  { %2888 = vmatpush3.msra.mxu0 %v3299_v50  ;;  %2915 = vmatpush3.msra.mxu1 %v3157_v35 }
 0x10c   :  { %2889 = vmatprep.subr.mxu0 %v3032_v3  ;;  %2916 = vmatprep.subr.mxu1 %v3032_v3 }
 0x10d   :  { %2890 = vmatpush3.msra.mxu0 %v3314_v54  ;;  %2917 = vmatpush3.msra.mxu1 %v3185_v45  ;;  %v524_v20 = vpop.f32.mrf.mxu1 }
 0x10e   :  { %2891 = vmatprep.subr.mxu0 %v3032_v3  ;;  %2918 = vmatprep.subr.mxu1 %v3032_v3  ;;  %v525_v21 = vadd.f32 %v524_v20, %v436_v16 }
 0x10f   :  { %2892 = vmatpush3.msra.mxu0 %v3328_v31  ;;  %2893 = vmatprep.mubr.msk.f32.mxu0 %vm3033_vm0, %v3032_v3  ;;  %v2510_v30 = vpop.f32.mrf.mxu1 }
 0x110   :  { %2919 = vmatpush3.msra.mxu1 %v3198_v49  ;;  %2894 = vmatmul.mubr.f32.vlgmr.msra.gmra.mxu0 %v3779_v0 }
 0x111   :  { %2920 = vmatprep.subr.mxu1 %v3032_v3  ;;  %2931 = vmatprep.subr.mxu0 %v3032_v3 }
 0x112   :  { %2921 = vmatpush3.msra.mxu1 %v3234_v61  ;;  %2932 = vmatpush3.msra.mxu0 %v3121_v22 }
 0x113   :  { %2922 = vmatprep.subr.mxu1 %v3032_v3  ;;  %2933 = vmatprep.subr.mxu0 %v3032_v3 }
 0x114   :  { %2923 = vmatpush3.msra.mxu1 %v3247_v1  ;;  %2934 = vmatpush3.msra.mxu0 %v3124_v23 }
 0x115   :  { %2924 = vmatprep.subr.mxu1 %v3032_v3  ;;  %2935 = vmatprep.subr.mxu0 %v3032_v3 }
 0x116   :  { %2925 = vmatpush3.msra.mxu1 %v3270_v26  ;;  %2936 = vmatpush3.msra.mxu0 %v3127_v24 }
 0x117   :  { %2926 = vmatprep.subr.mxu1 %v3032_v3  ;;  %2937 = vmatprep.subr.mxu0 %v3032_v3 }
 0x118   :  { %2927 = vmatpush3.msra.mxu1 %v3287_v39  ;;  %2928 = vmatprep.mubr.msk.f32.mxu1 %vm3033_vm0, %v3032_v3 }
 0x119   :  { %2938 = vmatpush3.msra.mxu0 %v3136_v27  ;;  %2929 = vmatmul.mubr.f32.vlgmr.msra.gmra.mxu1 %v1460_v37 }
 0x11a   :  { %2939 = vmatprep.subr.mxu0 %v3032_v3  ;;  %2966 = vmatprep.subr.mxu1 %v3032_v3 }
 0x11b   :  { %2940 = vmatpush3.msra.mxu0 %v3141_v29  ;;  %2967 = vmatpush3.msra.mxu1 %v3065_v4 }
 0x11c   :  { %2941 = vmatprep.subr.mxu0 %v3032_v3  ;;  %2968 = vmatprep.subr.mxu1 %v3032_v3 }
 0x11d   :  { %2942 = vmatpush3.msra.mxu0 %v3170_v40  ;;  %2969 = vmatpush3.msra.mxu1 %v3067_v5 }
 0x11e   :  { %2943 = vmatprep.subr.mxu0 %v3032_v3  ;;  %2970 = vmatprep.subr.mxu1 %v3032_v3 }
 0x11f   :  { %2944 = vmatpush3.msra.mxu0 %v3188_v46  ;;  %2971 = vmatpush3.msra.mxu1 %v3069_v6 }
 0x120   :  { %2945 = vmatprep.subr.mxu0 %v3032_v3  ;;  %2972 = vmatprep.subr.mxu1 %v3032_v3 }
 0x121   :  { %2946 = vmatpush3.msra.mxu0 %v3210_v53  ;;  %2973 = vmatpush3.msra.mxu1 %v3081_v10 }
 0x122   :  { %2947 = vmatprep.subr.mxu0 %v3032_v3  ;;  %2974 = vmatprep.subr.mxu1 %v3032_v3 }
 0x123   :  { %2948 = vmatpush3.msra.mxu0 %v3223_v57  ;;  %2975 = vmatpush3.msra.mxu1 %v3083_v11 }
 0x124   :  { %2949 = vmatprep.subr.mxu0 %v3032_v3  ;;  %2976 = vmatprep.subr.mxu1 %v3032_v3 }
 0x125   :  { %2950 = vmatpush3.msra.mxu0 %v3258_v9  ;;  %2977 = vmatpush3.msra.mxu1 %v3085_v12 }
 0x126   :  { %2951 = vmatprep.subr.mxu0 %v3032_v3  ;;  %2978 = vmatprep.subr.mxu1 %v3032_v3  ;;  %v643_v4 = vpop.f32.mrf.mxu0 }
 0x127   :  { %2952 = vmatpush3.msra.mxu0 %v3277_v32  ;;  %2979 = vmatpush3.msra.mxu1 %v3104_v17  ;;  %v644_v5 = vadd.f32 %v643_v4, %v525_v21 }
 0x128   :  { %2953 = vmatprep.subr.mxu0 %v3032_v3  ;;  %2980 = vmatprep.subr.mxu1 %v3032_v3  ;;  %v2545_v6 = vpop.f32.mrf.mxu0 }
 0x129   :  { %2954 = vmatpush3.msra.mxu0 %v3296_v48  ;;  %2981 = vmatpush3.msra.mxu1 %v3129_v25 }
 0x12a   :  { %2955 = vmatprep.subr.mxu0 %v3032_v3  ;;  %2982 = vmatprep.subr.mxu1 %v3032_v3 }
 0x12b   :  { %2956 = vmatpush3.msra.mxu0 %v3311_v8  ;;  %2983 = vmatpush3.msra.mxu1 %v3138_v28 }
 0x12c   :  { %2957 = vmatprep.subr.mxu0 %v3032_v3  ;;  %2984 = vmatprep.subr.mxu1 %v3032_v3 }
 0x12d   :  { %2958 = vmatpush3.msra.mxu0 %v3325_v60  ;;  %2985 = vmatpush3.msra.mxu1 %v3157_v35 }
 0x12e   :  { %2959 = vmatprep.subr.mxu0 %v3032_v3  ;;  %2986 = vmatprep.subr.mxu1 %v3032_v3 }
 0x12f   :  { %2960 = vmatpush3.msra.mxu0 %v3342_v13  ;;  %2987 = vmatpush3.msra.mxu1 %v3185_v45  ;;  %v730_v10 = vpop.f32.mrf.mxu1 }
 0x130   :  { %2961 = vmatprep.subr.mxu0 %v3032_v3  ;;  %2988 = vmatprep.subr.mxu1 %v3032_v3  ;;  %v731_v11 = vadd.f32 %v730_v10, %v644_v5 }
 0x131   :  { %2962 = vmatpush3.msra.mxu0 %v3353_v42  ;;  %2963 = vmatprep.mubr.msk.f32.mxu0 %vm3033_vm0, %v3032_v3  ;;  %v2580_v12 = vpop.f32.mrf.mxu1 }
 0x132   :  { %2989 = vmatpush3.msra.mxu1 %v3198_v49  ;;  %2964 = vmatmul.mubr.f32.vlgmr.msra.gmra.mxu0 %v3765_v58  ;;  %v2018_v47 = vmax.f32 %v731_v11, 1e-24 }
 0x133   :  { %2990 = vmatprep.subr.mxu1 %v3032_v3  ;;  %2998 = vmatprep.mubr.msk.f32.mxu1 %vm3033_vm0, %v3032_v3 }
 0x134   :  { %2991 = vmatpush3.msra.mxu1 %v3234_v61  ;;  %3006 = vrsqrt.f32 %v2018_v47 }
 0x135   :  { %2992 = vmatprep.subr.mxu1 %v3032_v3 }
 0x136   :  { %2993 = vmatpush3.msra.mxu1 %v3247_v1 }
 0x137   :  { %2994 = vmatprep.subr.mxu1 %v3032_v3 }
 0x138   :  { %2995 = vmatpush3.msra.mxu1 %v3270_v26 }
 0x139   :  { %2996 = vmatprep.subr.mxu1 %v3032_v3 }
 0x13a   :  { %2997 = vmatpush3.msra.mxu1 %v3287_v39 }
 0x13b   :  { %2999 = vmatmul.mubr.f32.vlgmr.msra.gmra.mxu1 %v3765_v58 }
 0x141   :  { %v3007_v55 = vpop.eup %3006 }
 0x149   :  { %v822_v17 = vpop.f32.mrf.mxu0 }
 0x14b   :  { %v2615_v22 = vpop.f32.mrf.mxu0 }
 0x151   :  { %v973_v23 = vpop.f32.mrf.mxu1 }
 0x152   :  { %v974_v24 = vadd.f32 %v973_v23, %v822_v17 }
 0x153   :  { %v2650_v25 = vpop.f32.mrf.mxu1 }
 0x16a   :  { %v1077_v27 = vpop.f32.mrf.mxu0 }
 0x16b   :  { %v1078_v28 = vadd.f32 %v1077_v27, %v974_v24 }
 0x16c   :  { %v2685_v29 = vpop.f32.mrf.mxu0 }
 0x173   :  { %v1166_v34 = vpop.f32.mrf.mxu1 }
 0x174   :  { %v1167_v35 = vadd.f32 %v1166_v34, %v1078_v28 }
 0x175   :  { %v2720_v40 = vpop.f32.mrf.mxu1 }
 0x18c   :  { %v1285_v43 = vpop.f32.mrf.mxu0 }
 0x18d   :  { %v1286_v45 = vadd.f32 %v1285_v43, %v1167_v35 }
 0x18e   :  { %v2755_v46 = vpop.f32.mrf.mxu0 }
 0x195   :  { %v1372_v3 = vpop.f32.mrf.mxu1 }
 0x196   :  { %v1373_v49 = vadd.f32 %v1372_v3, %v1286_v45 }
 0x197   :  { %v2790_v51 = vpop.f32.mrf.mxu1 }
 0x198   :  { %v2020_v53 = vmax.f32 %v1373_v49, 1e-24 }
 0x19a   :  { %3008 = vrsqrt.f32 %v2020_v53 }
 0x1a7   :  { %v3009_v57 = vpop.eup %3008 }
 0x1a8   :  { %v2022_v61 = vmul.f32 %v3009_v57, %v3007_v55 }
 0x1af   :  { %v1464_v63 = vpop.f32.mrf.mxu0 }
 0x1b1   :  { %v2825_v1 = vpop.f32.mrf.mxu0 }
 0x1b7   :  { %v1615_v9 = vpop.f32.mrf.mxu1 }
 0x1b8   :  { %v1616_v48 = vadd.f32 %v1615_v9, %v1464_v63 }
 0x1b9   :  { %v2860_v14 = vpop.f32.mrf.mxu1 }
 0x1d0   :  { %v1719_v26 = vpop.f32.mrf.mxu0 }
 0x1d1   :  { %v1720_v60 = vadd.f32 %v1719_v26, %v1616_v48 }
 0x1d2   :  { %v2895_v31 = vpop.f32.mrf.mxu0 }
 0x1d9   :  { %v1808_v32 = vpop.f32.mrf.mxu1 }
 0x1da   :  { %v1809_v8 = vadd.f32 %v1808_v32, %v1720_v60 }
 0x1db   :  { %v2930_v36 = vpop.f32.mrf.mxu1 }
 0x1f2   :  { %v1927_v39 = vpop.f32.mrf.mxu0 }
 0x1f3   :  { %v1928_v54 = vadd.f32 %v1927_v39, %v1809_v8 }
 0x1f4   :  { %v2965_v50 = vpop.f32.mrf.mxu0 }
 0x1fb   :  { %v2014_v19 = vpop.f32.mrf.mxu1 }
 0x1fc   :  { %v2015_v62 = vadd.f32 %v2014_v19, %v1928_v54 }
 0x1fd   :  { %v3000_v13 = vpop.f32.mrf.mxu1 }
 0x1fe   :  { %v2023_v59 = vmul.f32 %v2022_v61, %v2015_v62 }
 0x200   :  { %v2026_v42 = vsel %vm2025_vm1, %v2023_v59, 0.0 }
 0x201   :  { %2027 = vadd.xlane.f32.xlu0 %v2026_v42 }
 0x28a   :  { %v2028_v7 = vpop.xlane.xlu0 %2027 }
 0x28b   :  { %v2029_v41 = vrot.slane %v2028_v7, 4 }
 0x28d   :  { %v2030_v58 = vadd.f32 %v2029_v41, %v2028_v7 }
 0x28f   :  { %v2031_v0 = vrot.slane %v2030_v58, 2 }
 0x291   :  { %v2032_v37 = vadd.f32 %v2031_v0, %v2030_v58 }
 0x293   :  { %v2033_v33 = vrot.slane %v2032_v37, 1 }
 0x295   :  { %v2034_v52 = vadd.f32 %v2033_v33, %v2032_v37 }
 0x297   :  { %3001 = vpush %v2034_v52 }
 0x2c8   :  { %s3002_s20 = spop %3001 }
 0x2c9   :  { %v2036_v56 = vstv %s3002_s20 }
 0x2ca   :  { %v2037_v38 = vsub.f32 0.0, %v2036_v56 }
 0x2cc   :  { %2038 = vst [vmem:[#allocation2] sm:$0xff] %v2037_v38 }
 0x2cd   :  { %3021 = shalt.err (!%p3018_p4)
}
 0x2ce   :  { %2048 = dma.vmem_to_hbm [thread:$0]  %s2046_s19, 128, %s3973_s3, [#allocation3]  }
 0x2cf   :  { %3030 = dma.done.wait [#allocation3], 128  }
 0x2d0   :  { %3031 = vsyncadd [#allocation3], 4294967168 }
 0x2d1   :  { %2052 = vsyncpa [#allocation3], 1 }

</bundles_post_ra>
